<compile_context>
chip_gen: v7x
topology: tpu7x:2x2x1
jax: 0.10.0
libtpu: 0.0.40
codegen_flags: <defaults>
</compile_context>

<pallas_src>
import functools
import math

import jax
import jax.numpy as jnp
from jax.experimental import pallas as pl
from jax.experimental.pallas import tpu as pltpu


# --------------------------- generation-aware sizing --------------------------

def _vmem_limit_bytes() -> int:
    """VMEM budget from physical capacity (v5e/v6e: 128 MiB, v7x: 64 MiB)."""
    try:
        cap = int(pltpu.get_tpu_info().vmem_capacity_bytes)
    except Exception:
        cap = 64 * 1024 * 1024  # conservative fallback (v7x-sized)
    return min((cap * 3) // 4, 100 * 1024 * 1024)


def _pick_tile(dim: int, max_tile: int, multiple: int) -> int:
    """Largest tile <= max_tile that divides `dim` and is a multiple of `multiple`.

    Falls back to the full extent (always a legal Pallas block shape).
    # TODO(synk): pad + masked tail for huge dims with no aligned divisor.
    """
    if dim <= max_tile:
        return dim
    best = 0
    t = multiple
    while t <= max_tile:
        if dim % t == 0:
            best = t
        t += multiple
    return best if best > 0 else dim


# ----------------------------- Linear (no bias) ------------------------------

def _linear_kernel(x_ref, w_ref, o_ref, acc_ref):
    # x_ref: (tm, tk); w_ref: (tn, tk) in nn.Linear (out, in) layout.
    # Contract the shared K axis in-kernel -> no wrapper-side weight transpose.
    @pl.when(pl.program_id(2) == 0)
    def _():
        acc_ref[...] = jnp.zeros_like(acc_ref)

    acc_ref[...] += jax.lax.dot_general(
        x_ref[...], w_ref[...],
        dimension_numbers=(((1,), (1,)), ((), ())),
        preferred_element_type=jnp.float32,
    )

    @pl.when(pl.program_id(2) == pl.num_programs(2) - 1)
    def _():
        o_ref[...] = acc_ref[...].astype(o_ref.dtype)


def linear_no_bias(x2d, w, *, vmem_limit):
    """y = x2d @ w.T with w stored like nn.Linear.weight: (out_features, in_features)."""
    rows, k = x2d.shape
    n, k2 = w.shape
    assert k == k2, "inner dimensions must match"
    tm = _pick_tile(rows, 256, 8)
    tn = _pick_tile(n, 512, 128)
    tk = _pick_tile(k, 512, 128)
    grid = (rows // tm, n // tn, k // tk)
    return pl.pallas_call(
        _linear_kernel,
        out_shape=jax.ShapeDtypeStruct((rows, n), x2d.dtype),
        grid=grid,
        in_specs=[
            pl.BlockSpec((tm, tk), lambda i, j, kk: (i, kk)),
            pl.BlockSpec((tn, tk), lambda i, j, kk: (j, kk)),
        ],
        out_specs=pl.BlockSpec((tm, tn), lambda i, j, kk: (i, j)),
        scratch_shapes=[pltpu.VMEM((tm, tn), jnp.float32)],
        compiler_params=pltpu.CompilerParams(
            dimension_semantics=("parallel", "parallel", "arbitrary"),
            vmem_limit_bytes=vmem_limit,
        ),
    )(x2d, w)


# ----------------------- Flash-style attention kernel ------------------------

def _flash_attention_kernel(q_ref, k_ref, v_ref, mask_ref, o_ref,
                            m_sc, l_sc, acc_sc, *, scale):
    kv_idx = pl.program_id(3)

    @pl.when(kv_idx == 0)
    def _():
        m_sc[...] = jnp.full_like(m_sc, -jnp.inf)
        l_sc[...] = jnp.zeros_like(l_sc)
        acc_sc[...] = jnp.zeros_like(acc_sc)

    # Pre-scale Q once per (tq, d_k) tile instead of dividing the (tq, tkv) scores.
    q = q_ref[...] * scale                                   # input dtype feeds the MXU
    s = jax.lax.dot_general(                                 # (tq, tkv), f32 accumulation
        q, k_ref[...], dimension_numbers=(((1,), (1,)), ((), ())),
        preferred_element_type=jnp.float32)
    s = jnp.where(mask_ref[...].astype(jnp.int32) == 0, -1e9, s)

    # Online (numerically stable) softmax across KV tiles.
    m_prev = m_sc[...]
    m_new = jnp.maximum(m_prev, jnp.max(s, axis=-1, keepdims=True))
    alpha = jnp.exp(m_prev - m_new)
    p = jnp.exp(s - m_new)
    l_sc[...] = alpha * l_sc[...] + jnp.sum(p, axis=-1, keepdims=True)
    acc_sc[...] = alpha * acc_sc[...] + jnp.dot(
        p.astype(v_ref.dtype), v_ref[...], preferred_element_type=jnp.float32)
    m_sc[...] = m_new

    # TODO(synk): attention-score dropout not implemented (inference mode, p=0).
    @pl.when(kv_idx == pl.num_programs(3) - 1)
    def _():
        inv_l = pl.reciprocal(l_sc[...], approx=True)        # EUP slot, frees VALU
        o_ref[...] = (acc_sc[...] * inv_l).astype(o_ref.dtype)


def _attention_call(q_arr, k_arr, v_arr, mask4, *, grid, in_specs, out_specs,
                    out_shape, tq, d_k, scale, vmem_limit):
    kern = functools.partial(_flash_attention_kernel, scale=scale)
    return pl.pallas_call(
        kern,
        out_shape=out_shape,
        grid=grid,
        in_specs=in_specs,
        out_specs=out_specs,
        scratch_shapes=[
            pltpu.VMEM((tq, 1), jnp.float32),     # running max
            pltpu.VMEM((tq, 1), jnp.float32),     # running denominator
            pltpu.VMEM((tq, d_k), jnp.float32),   # output accumulator
        ],
        compiler_params=pltpu.CompilerParams(
            dimension_semantics=("parallel", "parallel", "parallel", "arbitrary"),
            vmem_limit_bytes=vmem_limit,
        ),
    )(q_arr, k_arr, v_arr, mask4)


def _normalize_mask(mask, s):
    """Promote mask to 4-D int8 (mb, mh, s, s) WITHOUT broadcasting batch/head dims."""
    m = jnp.asarray(mask)
    while m.ndim < 4:
        m = m[None]
    mb, mh = int(m.shape[0]), int(m.shape[1])
    m = jnp.broadcast_to(m, (mb, mh, s, s)).astype(jnp.int8)
    return m, mb, mh


# ------------------------------ Full forward ---------------------------------

def multi_head_attention_block(q, k, v, mask, w_q, w_k, w_v, w_o, num_heads):
    """Forward pass of MultiHeadAttentionBlock.

    q, k, v:  (batch, seq, d_model)
    mask:     broadcastable to (batch, num_heads, seq, seq); 0 => masked out
    w_q/k/v/o: (d_model, d_model) in nn.Linear.weight layout (out, in)
    """
    b, s, d_model = q.shape
    assert d_model % num_heads == 0, "d_model is not divisible by h"
    d_k = d_model // num_heads
    scale = 1.0 / math.sqrt(d_k)
    vmem_limit = _vmem_limit_bytes()

    mask4, mb, mh = _normalize_mask(mask, s)

    # ---- Q/K/V projections (fused for self-attention: x read from HBM once) ----
    if (q is k) and (k is v):
        w_qkv = jnp.concatenate([w_q, w_k, w_v], axis=0)       # (3*d_model, d_model)
        qkv = linear_no_bias(q.reshape(b * s, d_model), w_qkv,
                             vmem_limit=vmem_limit).reshape(b, s, 3 * d_model)
        proj = (qkv, qkv, qkv)
        head_offs = (0, num_heads, 2 * num_heads)               # in units of d_k blocks
    else:
        proj = tuple(
            linear_no_bias(x.reshape(b * s, d_model), w,
                           vmem_limit=vmem_limit).reshape(b, s, d_model)
            for x, w in ((q, w_q), (k, w_k), (v, w_v)))
        head_offs = (0, 0, 0)

    tq = _pick_tile(s, 256, 8)
    tkv = _pick_tile(s, 512, 128)
    grid = (b, num_heads, s // tq, s // tkv)

    def mask_map(bi, hi, qi, ki):
        return (bi if mb > 1 else 0, hi if mh > 1 else 0, qi, ki)
    mask_spec = pl.BlockSpec((None, None, tq, tkv), mask_map)

    if d_k % 128 == 0:
        # Head slices read straight from the (b, s, [3*]d_model) projection; context
        # written straight into (b, s, d_model): no head split/merge transposes and
        # lane-dense output stores.
        qo, ko, vo = head_offs
        q_spec = pl.BlockSpec((None, tq, d_k), lambda bi, hi, qi, ki: (bi, qi, qo + hi))
        k_spec = pl.BlockSpec((None, tkv, d_k), lambda bi, hi, qi, ki: (bi, ki, ko + hi))
        v_spec = pl.BlockSpec((None, tkv, d_k), lambda bi, hi, qi, ki: (bi, ki, vo + hi))
        o_spec = pl.BlockSpec((None, tq, d_k), lambda bi, hi, qi, ki: (bi, qi, hi))
        ctx = _attention_call(
            proj[0], proj[1], proj[2], mask4,
            grid=grid, in_specs=[q_spec, k_spec, v_spec, mask_spec],
            out_specs=o_spec,
            out_shape=jax.ShapeDtypeStruct((b, s, d_model), q.dtype),
            tq=tq, d_k=d_k, scale=scale, vmem_limit=vmem_limit)
        x2d = ctx.reshape(b * s, d_model)
    else:
        # Fallback for small (non lane-aligned) heads: explicit head split/merge.
        def split_heads(a, off):
            sl = a[..., off * d_k:(off + num_heads) * d_k]
            return sl.reshape(b, s, num_heads, d_k).transpose(0, 2, 1, 3)
        qh, kh, vh = (split_heads(a, o) for a, o in zip(proj, head_offs))
        q_spec = pl.BlockSpec((None, None, tq, d_k), lambda bi, hi, qi, ki: (bi, hi, qi, 0))
        kv_spec = pl.BlockSpec((None, None, tkv, d_k), lambda bi, hi, qi, ki: (bi, hi, ki, 0))
        o_spec = pl.BlockSpec((None, None, tq, d_k), lambda bi, hi, qi, ki: (bi, hi, qi, 0))
        attn = _attention_call(
            qh, kh, vh, mask4,
            grid=grid, in_specs=[q_spec, kv_spec, kv_spec, mask_spec],
            out_specs=o_spec,
            out_shape=jax.ShapeDtypeStruct((b, num_heads, s, d_k), q.dtype),
            tq=tq, d_k=d_k, scale=scale, vmem_limit=vmem_limit)
        x2d = attn.transpose(0, 2, 1, 3).reshape(b * s, d_model)

    # ---- Output projection ----
    return linear_no_bias(x2d, w_o, vmem_limit=vmem_limit).reshape(b, s, d_model)


# ------------------------------- Reference -----------------------------------

def _reference_forward(q, k, v, mask, w_q, w_k, w_v, w_o, num_heads):
    b, s, d_model = q.shape
    d_k = d_model // num_heads
    with jax.default_matmul_precision("highest"):
        query = (q @ w_q.T).reshape(b, s, num_heads, d_k).transpose(0, 2, 1, 3)
        key = (k @ w_k.T).reshape(b, s, num_heads, d_k).transpose(0, 2, 1, 3)
        value = (v @ w_v.T).reshape(b, s, num_heads, d_k).transpose(0, 2, 1, 3)
        scores = jnp.einsum("bhqd,bhkd->bhqk", query, key) / math.sqrt(d_k)
        scores = jnp.where(mask == 0, -1e9, scores)
        attn = jax.nn.softmax(scores, axis=-1)
        x = jnp.einsum("bhqk,bhkd->bhqd", attn, value)
        x = x.transpose(0, 2, 1, 3).reshape(b, s, d_model)
        return x @ w_o.T


if __name__ == "__main__":
    def run_case(batch, seq_len, d_model, num_heads, tol):
        key = jax.random.PRNGKey(0)
        k_x, k_wq, k_wk, k_wv, k_wo = jax.random.split(key, 5)
        w_scale = 1.0 / math.sqrt(d_model)

        x_in = jax.random.normal(k_x, (batch, seq_len, d_model), dtype=jnp.float32)
        w_q = jax.random.normal(k_wq, (d_model, d_model), dtype=jnp.float32) * w_scale
        w_k = jax.random.normal(k_wk, (d_model, d_model), dtype=jnp.float32) * w_scale
        w_v = jax.random.normal(k_wv, (d_model, d_model), dtype=jnp.float32) * w_scale
        w_o = jax.random.normal(k_wo, (d_model, d_model), dtype=jnp.float32) * w_scale

        # Causal mask, broadcastable to (batch, heads, seq, seq); 0 => masked out.
        mask = jnp.tril(jnp.ones((seq_len, seq_len), dtype=jnp.int32)).reshape(
            1, 1, seq_len, seq_len)

        out = multi_head_attention_block(
            x_in, x_in, x_in, mask, w_q, w_k, w_v, w_o, num_heads)
        out = jax.block_until_ready(out)

        ref = _reference_forward(x_in, x_in, x_in, mask, w_q, w_k, w_v, w_o, num_heads)
        assert out.shape == (batch, seq_len, d_model)
        err = jnp.max(jnp.abs(out - ref))
        assert jnp.allclose(out, ref, atol=tol, rtol=tol), (
            f"mismatch vs reference (max abs err {err}) "
            f"for b={batch}, s={seq_len}, d={d_model}, h={num_heads}")

    # Small module-sized case (d_k = 8): fused QKV + head split/merge fallback path.
    run_case(batch=2, seq_len=8, d_model=32, num_heads=4, tol=5e-3)
    # Lane-aligned case (d_k = 128): fused QKV, direct head slicing, multi-tile
    # flash KV loop (tq=256, tkv=512 over S=1024).
    run_case(batch=1, seq_len=1024, d_model=256, num_heads=2, tol=1e-2)

    print("KERNEL_OK")
</pallas_src>

<mosaic_0001>
module attributes {stable_mosaic.version = 11 : i64} {
  func.func @_linear_kernel(%arg0: i32, %arg1: i32, %arg2: i32, %arg3: memref<16x32xf32, #tpu.memory_space<vmem>>, %arg4: memref<96x32xf32, #tpu.memory_space<vmem>>, %arg5: memref<16x96xf32, #tpu.memory_space<vmem>>, %arg6: memref<16x96xf32, #tpu.memory_space<vmem>>) attributes {dimension_semantics = [#tpu.dimension_semantics<parallel>, #tpu.dimension_semantics<parallel>, #tpu.dimension_semantics<arbitrary>], iteration_bounds = array<i64: 1, 1, 1>, scalar_prefetch = 0 : i64, scratch_operands = 1 : i64, tpu.core_type = #tpu.core_type<tc>, window_params = [{transform_indices = @transform_0, window_bounds = array<i64: 16, 32>}, {transform_indices = @transform_1, window_bounds = array<i64: 96, 32>}, {transform_indices = @transform_2, window_bounds = array<i64: 16, 96>}]} {
    %c0_i32 = arith.constant 0 : i32
    %0 = arith.cmpi eq, %arg2, %c0_i32 : i32
    %1 = arith.extui %0 : i1 to i32
    %c0_i32_0 = arith.constant 0 : i32
    %2 = arith.cmpi ne, %1, %c0_i32_0 : i32
    scf.if %2 {
      %cst_10 = arith.constant 0.000000e+00 : f32
      %12 = vector.broadcast %cst_10 : f32 to vector<16x96xf32>
      %c0_11 = arith.constant 0 : index
      %c0_12 = arith.constant 0 : index
      %13 = vector.load %arg6[%c0_11, %c0_12] : memref<16x96xf32, #tpu.memory_space<vmem>>, vector<16x96xf32>
      tpu.vector_store %arg6[%c0_11, %c0_12], %12 {strides = array<i32>} : memref<16x96xf32, #tpu.memory_space<vmem>>, vector<16x96xf32>,
    } else {
    }
    %c0 = arith.constant 0 : index
    %c0_1 = arith.constant 0 : index
    %3 = vector.load %arg6[%c0, %c0_1] : memref<16x96xf32, #tpu.memory_space<vmem>>, vector<16x96xf32>
    %c0_2 = arith.constant 0 : index
    %c0_3 = arith.constant 0 : index
    %4 = vector.load %arg3[%c0_2, %c0_3] : memref<16x32xf32, #tpu.memory_space<vmem>>, vector<16x32xf32>
    %c0_4 = arith.constant 0 : index
    %c0_5 = arith.constant 0 : index
    %5 = vector.load %arg4[%c0_4, %c0_5] : memref<96x32xf32, #tpu.memory_space<vmem>>, vector<96x32xf32>
    %cst = arith.constant dense<0.000000e+00> : vector<16x96xf32>
    %6 = tpu.matmul %4, %5, %cst {dimension_numbers = #tpu.dot_dimension_numbers<[1], [1], [0], [0], [0, 0, 1, 0], [], []>} : vector<16x32xf32>, vector<96x32xf32>, vector<16x96xf32> -> vector<16x96xf32>
    %7 = arith.addf %3, %6 : vector<16x96xf32>
    %c0_6 = arith.constant 0 : index
    %c0_7 = arith.constant 0 : index
    %8 = vector.load %arg6[%c0_6, %c0_7] : memref<16x96xf32, #tpu.memory_space<vmem>>, vector<16x96xf32>
    tpu.vector_store %arg6[%c0_6, %c0_7], %7 {strides = array<i32>} : memref<16x96xf32, #tpu.memory_space<vmem>>, vector<16x96xf32>,
    %c0_i32_8 = arith.constant 0 : i32
    %9 = arith.cmpi eq, %arg2, %c0_i32_8 : i32
    %10 = arith.extui %9 : i1 to i32
    %c0_i32_9 = arith.constant 0 : i32
    %11 = arith.cmpi ne, %10, %c0_i32_9 : i32
    scf.if %11 {
      %c0_10 = arith.constant 0 : index
      %c0_11 = arith.constant 0 : index
      %12 = vector.load %arg6[%c0_10, %c0_11] : memref<16x96xf32, #tpu.memory_space<vmem>>, vector<16x96xf32>
      %c0_12 = arith.constant 0 : index
      %c0_13 = arith.constant 0 : index
      %13 = vector.load %arg5[%c0_12, %c0_13] : memref<16x96xf32, #tpu.memory_space<vmem>>, vector<16x96xf32>
      tpu.vector_store %arg5[%c0_12, %c0_13], %12 {strides = array<i32>} : memref<16x96xf32, #tpu.memory_space<vmem>>, vector<16x96xf32>,
    } else {
    }
    return
  }
  func.func @transform_0(%arg0: i32, %arg1: i32, %arg2: i32) -> (i32, i32) {
    %c0_i32 = arith.constant 0 : i32
    return %arg0, %arg2 : i32, i32
  }
  func.func @transform_1(%arg0: i32, %arg1: i32, %arg2: i32) -> (i32, i32) {
    %c0_i32 = arith.constant 0 : i32
    return %arg1, %arg2 : i32, i32
  }
  func.func @transform_2(%arg0: i32, %arg1: i32, %arg2: i32) -> (i32, i32) {
    %c0_i32 = arith.constant 0 : i32
    return %arg0, %arg1 : i32, i32
  }
}

</mosaic_0001>

<bundles_post_ra>
// kernel: tpu_custom_call.1
= control target key start
LH: loop header
LB: loop body
LE: loop exit
PB: predicated region body
PF: predicated region fallthrough
CT: control target
= control target key end

     0   :  { %vm35_vm0 = vcmask 261120   ;;  %vm16_vm1 = vcmask 785408   ;;  %v300_v6 = vmov 0.0   ;;  %s411_s0 = inlined_call_operand.vmem [shape: f32[16,32], index: 0, kind: input, shape index: {}]   ;;  %s412_s1 = inlined_call_operand.vmem [shape: f32[96,32], index: 1, kind: input, shape index: {}]   ;;  %s413_s2 = inlined_call_operand.hbm [shape: f32[16,96], index: 2, kind: output, shape index: {}]  }
   0x1   :  { %v23_v0 = vld [vmem:[%s412_s1] sm:$0xff]  ;;  %v24_v1 = vld [vmem:[%s412_s1 + $0x8] sm:$0xff]  ;;  %v25_v2 = vld [vmem:[%s412_s1 + $0x10] sm:$0xff]  ;;  %18 = vst.msk [vmem:[#allocation2 + $0x8] sm:$0xff] %vm16_vm1, %v300_v6 }
   0x2   :  { %v236_v3 = vpack.c.bf16 %v24_v1, %v23_v0  ;;  %vm330_vm2 = vmpackc.low %vm35_vm0, %vm35_vm0  ;;  %v26_v5 = vld [vmem:[%s412_s1 + $0x18] sm:$0xff]  ;;  %17 = vst.msk [vmem:[#allocation2] sm:$0xff] %vm16_vm1, %v300_v6  ;;  %v21_v8 = vld [vmem:[%s411_s0] sm:$0xff] }
   0x3   :  { %v242_v7 = vpack.c.bf16 %v26_v5, %v25_v2  ;;  %233 = vmatprep.mubr.msk.f32.mxu0 %vm35_vm0, %v21_v8 }
   0x4   :  { %238 = vmatprep.subr.msk.bf16.mxu0 %vm330_vm2, %v236_v3 }
   0x5   :  { %241 = vmatpush3.bf16.xpose.msk.msra.mxu0 %vm330_vm2, %v236_v3 }
   0x6   :  { %244 = vmatprep.subr.msk.bf16.mxu0 %vm330_vm2, %v242_v7 }
   0x7   :  { %7 = vsyncpa [#allocation4], 0  ;;  %v27_v9 = vld [vmem:[%s412_s1 + $0x20] sm:$0xff]  ;;  %v28_v10 = vld [vmem:[%s412_s1 + $0x28] sm:$0xff] }
   0x8   :  { %v248_v11 = vpack.c.bf16 %v28_v10, %v27_v9  ;;  %v29_v12 = vld [vmem:[%s412_s1 + $0x30] sm:$0xff]  ;;  %v30_v13 = vld [vmem:[%s412_s1 + $0x38] sm:$0xff]  ;;  %v31_v15 = vld [vmem:[%s412_s1 + $0x40] sm:$0xff] }
   0x9   :  { %v254_v14 = vpack.c.bf16 %v30_v13, %v29_v12  ;;  %v32_v16 = vld [vmem:[%s412_s1 + $0x48] sm:$0xff]  ;;  %v33_v18 = vld [vmem:[%s412_s1 + $0x50] sm:$0xff]  ;;  %v34_v19 = vld [vmem:[%s412_s1 + $0x58] sm:$0xff]  ;;  %s301_s1 = smov [#allocation3]  }
   0xa   :  { %v260_v17 = vpack.c.bf16 %v32_v16, %v31_v15  ;;  %v266_v20 = vpack.c.bf16 %v34_v19, %v33_v18  ;;  %v22_v21 = vld [vmem:[%s411_s0 + $0x8] sm:$0xff]  ;;  %v19_v23 = vld [vmem:[#allocation2] sm:$0xff]  ;;  %s170_s9 = sshll.u32 %s301_s1, 4  ;;  %s171_s9 = int_to_ptr.vmem [resolvable:$true] %s170_s9 }
   0xb   :  { %v20_v22 = vld [vmem:[#allocation2 + $0x8] sm:$0xff]  ;;  %s276_s0 = scalar_lea.vmem %s171_s9, 256  ;;  %p281_p1 = scmp.lt.s32.totalorder %s171_s9, %s171_s9 }
   0xc   :  { %p277_p0 = scmp.ne.s32.totalorder %s171_s9, %s276_s0  ;;  %p282_p2 = scmp.lt.s32.totalorder %s276_s0, %s276_s0 }
   0xd   :  { %247 = vmatpush3.bf16.xpose.msk.msra.mxu0 %vm330_vm2, %v242_v7 }
   0xe   :  { %250 = vmatprep.subr.msk.bf16.mxu0 %vm330_vm2, %v248_v11  ;;  %p283_p3 = por %p282_p2, %p281_p1 }
  0x10   :  { %p284_p4 = pnand %p283_p3, %p277_p0 }
  0x15   :  { %253 = vmatpush3.bf16.xpose.msk.msra.mxu0 %vm330_vm2, %v248_v11 }
  0x16   :  { %256 = vmatprep.subr.msk.bf16.mxu0 %vm330_vm2, %v254_v14 }
  0x1d   :  { %259 = vmatpush3.bf16.xpose.msk.msra.mxu0 %vm330_vm2, %v254_v14 }
  0x1e   :  { %262 = vmatprep.subr.msk.bf16.mxu0 %vm330_vm2, %v260_v17 }
  0x25   :  { %265 = vmatpush3.bf16.xpose.msk.msra.mxu0 %vm330_vm2, %v260_v17 }
  0x26   :  { %268 = vmatprep.subr.msk.bf16.mxu0 %vm330_vm2, %v266_v20 }
  0x2d   :  { %271 = vmatpush3.bf16.xpose.msk.msra.mxu0 %vm330_vm2, %v266_v20 }
  0x34   :  { %234 = vmatmul.mubr.msk.f32.vlgmr.msra.gmra.mrb[0].mxu0 %vm35_vm0, %v22_v21 }
 0x107   :  { %v235_v24 = vpop.f32.mrb[0].mxu0 }
 0x108   :  { %v154_v25 = vadd.f32 %v235_v24, %v20_v22  ;;  %v144_v26 = vpop.f32.mrb[1].mxu0 }
 0x109   :  { %v153_v27 = vadd.f32 %v144_v26, %v19_v23 }
 0x10a   :  { %157 = vst.msk [vmem:[#allocation2 + $0x8] sm:$0xff] %vm16_vm1, %v154_v25 }
 0x10b   :  { %156 = vst.msk [vmem:[#allocation2] sm:$0xff] %vm16_vm1, %v153_v27 }
 0x111   :  { %v162_v28 = vld [vmem:[#allocation2 + $0x8] sm:$0xff] }
 0x112   :  { %v161_v29 = vld [vmem:[#allocation2] sm:$0xff]  ;;  %164 = vst.msk [vmem:[#allocation3 + $0x8] sm:$0xff] %vm16_vm1, %v162_v28 }
 0x113   :  { %163 = vst.msk [vmem:[#allocation3] sm:$0xff] %vm16_vm1, %v161_v29 }
 0x114   :  { %287 = shalt.err (!%p284_p4)
}
 0x115   :  { %s288_s12 = scalar_lea.hbm %s413_s2, 256 }
 0x116   :  { %p289_p5 = scmp.ne.s32.totalorder %s413_s2, %s288_s12  ;;  %p292_p6 = scmp.lt.u32.totalorder %s288_s12, %s413_s2 }
 0x118   :  { %p294_p7 = pnand %p292_p6, %p289_p5 }
 0x11a   :  { %297 = shalt.err (!%p294_p7)
}
 0x11b   :  { %s302_s17 = smov 128   ;;  %s303_s18 = smov 8  }
 0x11c   :  { %176 = dma.vmem_to_hbm [thread:$0]  %s171_s9, 256, %s413_s2, [#allocation4], %s302_s17, %s302_s17, %s303_s18  }
 0x11d   :  { %298 = dma.done.wait [#allocation4], 256  }
 0x11e   :  { %299 = vsyncadd [#allocation4], 4294967040 }
 0x11f   :  { %180 = vsyncpa [#allocation4], 1 }

</bundles_post_ra>
